<compile_context>
chip_gen: v7x
topology: tpu7x:2x2x1
jax: 0.10.0
libtpu: 0.0.40
codegen_flags: <defaults>
</compile_context>

<pallas_src>
import functools
import math

import jax
import jax.numpy as jnp
from jax.experimental import pallas as pl
from jax.experimental.pallas import tpu as pltpu


def _reltanh_kernel(x_ref, o_ref, *, alpha, beta, alpha_d1, beta_d1):
    # Native-dtype DMA; upcast to f32 only for the math (v5e VPU/EUP have no
    # bf16 path anyway), write back in the output dtype.
    x = x_ref[...].astype(jnp.float32)

    alpha_mask = x >= alpha
    beta_mask = x <= beta

    x_alpha = (x - alpha) * alpha_d1 + alpha
    x_beta = (x - beta) * beta_d1 + beta
    x_act = jnp.tanh(x)

    out = jnp.where(alpha_mask, x_alpha, jnp.where(beta_mask, x_beta, x_act))
    o_ref[...] = out.astype(o_ref.dtype)


def _choose_layout(n, itemsize):
    """Pick (lane, pad, rows, row_block) for a lane-dense 2D layout."""
    # Widest lane that divides n -> zero padding / no extra HBM round trip.
    lane, pad = 128, (-n) % 128
    for cand in (1024, 512, 256, 128):
        if n % cand == 0:
            lane, pad = cand, 0
            break
    rows = (n + pad) // lane

    # Target ~2 MiB blocks: big enough to amortize per-grid-step overhead
    # (~85% of HBM roofline on v6e), small enough that double-buffered
    # input+output (<= ~8 MiB) fits v5e's 16 MiB and v7x's 32 MiB scoped VMEM.
    target_bytes = 2 * 1024 * 1024
    row_block = max(1, target_bytes // (lane * itemsize))
    if row_block >= rows:
        row_block = rows                      # one block; full dims are legal
    else:
        row_block = max(8, (row_block // 8) * 8)   # keep (8, 128) tiling legal
    return lane, pad, rows, row_block


def reltanh(x, alpha=0.0, beta=-1.5):
    """Apply ReLTanh elementwise. Works for any input shape / rank / dtype."""
    assert alpha > beta
    orig_shape = x.shape
    orig_dtype = x.dtype
    n = x.size
    itemsize = jnp.dtype(orig_dtype).itemsize

    lane, pad, rows, row_block = _choose_layout(n, itemsize)

    flat = x.reshape(-1)
    if pad:  # only hit when n is not a multiple of 128 (rare, tiny pad)
        flat = jnp.pad(flat, (0, pad))
    x2d = flat.reshape(rows, lane)

    # Compile-time scalar constants (keep the EUP for the per-element tanh).
    alpha_tanh = math.tanh(alpha)
    beta_tanh = math.tanh(beta)
    kernel = functools.partial(
        _reltanh_kernel,
        alpha=float(alpha),
        beta=float(beta),
        alpha_d1=float(1.0 - alpha_tanh * alpha_tanh),
        beta_d1=float(1.0 - beta_tanh * beta_tanh),
    )

    grid = (pl.cdiv(rows, row_block),)
    out2d = pl.pallas_call(
        kernel,
        out_shape=jax.ShapeDtypeStruct((rows, lane), orig_dtype),
        grid_spec=pltpu.PrefetchScalarGridSpec(
            num_scalar_prefetch=0,
            grid=grid,
            in_specs=[pl.BlockSpec((row_block, lane), lambda i: (i, 0))],
            out_specs=pl.BlockSpec((row_block, lane), lambda i: (i, 0)),
        ),
        compiler_params=pltpu.CompilerParams(
            dimension_semantics=("parallel",)),
    )(x2d)

    if pad:
        return out2d.reshape(-1)[:n].reshape(orig_shape)
    return out2d.reshape(orig_shape)


def _reltanh_ref(x, alpha=0.0, beta=-1.5):
    """Pure-JAX reference mirroring the PyTorch forward exactly."""
    x = x.astype(jnp.float32)
    alpha_tanh = jnp.tanh(alpha)
    beta_tanh = jnp.tanh(beta)
    ad1 = 1.0 - alpha_tanh ** 2
    bd1 = 1.0 - beta_tanh ** 2
    a_mask = x >= alpha
    b_mask = x <= beta
    act_mask = ~(a_mask | b_mask)
    x_alpha = (x - alpha) * ad1 + alpha
    x_beta = (x - beta) * bd1 + beta
    x_act = jnp.tanh(x)
    return x_alpha * a_mask + x_beta * b_mask + x_act * act_mask


if __name__ == "__main__":
    key = jax.random.PRNGKey(0)

    # NCHW input, small shape: batch=2, channels=4, spatial=16x16.
    x = jax.random.normal(key, (2, 4, 16, 16), dtype=jnp.float32) * 2.0
    out = jax.block_until_ready(reltanh(x, alpha=0.0, beta=-1.5))
    ref = _reltanh_ref(x, alpha=0.0, beta=-1.5)
    assert out.shape == x.shape and out.dtype == x.dtype
    assert jnp.max(jnp.abs(out.astype(jnp.float32) - ref)) < 1e-5

    # Ragged / non-128-divisible shape exercises the fallback pad path.
    x2 = jax.random.normal(jax.random.PRNGKey(1), (3, 5, 7, 11), dtype=jnp.float32) * 2.0
    out2 = jax.block_until_ready(reltanh(x2, alpha=0.0, beta=-1.5))
    ref2 = _reltanh_ref(x2, alpha=0.0, beta=-1.5)
    assert out2.shape == x2.shape
    assert jnp.max(jnp.abs(out2 - ref2)) < 1e-5

    print("KERNEL_OK")
</pallas_src>

<mosaic_0001>
module attributes {stable_mosaic.version = 11 : i64} {
  func.func @_reltanh_kernel(%arg0: i32, %arg1: memref<2x1024xf32, #tpu.memory_space<vmem>>, %arg2: memref<2x1024xf32, #tpu.memory_space<vmem>>) attributes {dimension_semantics = [#tpu.dimension_semantics<parallel>], iteration_bounds = array<i64: 1>, scalar_prefetch = 0 : i64, scratch_operands = 0 : i64, tpu.core_type = #tpu.core_type<tc>, window_params = [{transform_indices = @transform_0, window_bounds = array<i64: 2, 1024>}, {transform_indices = @transform_1, window_bounds = array<i64: 2, 1024>}]} {
    %c0 = arith.constant 0 : index
    %c0_0 = arith.constant 0 : index
    %0 = vector.load %arg1[%c0, %c0_0] : memref<2x1024xf32, #tpu.memory_space<vmem>>, vector<2x1024xf32>
    %cst = arith.constant 0.000000e+00 : f32
    %1 = vector.broadcast %cst : f32 to vector<2x1024xf32>
    %2 = arith.cmpf oge, %0, %1 : vector<2x1024xf32>
    %cst_1 = arith.constant -1.500000e+00 : f32
    %3 = vector.broadcast %cst_1 : f32 to vector<2x1024xf32>
    %4 = arith.cmpf ole, %0, %3 : vector<2x1024xf32>
    %cst_2 = arith.constant 0.000000e+00 : f32
    %5 = vector.broadcast %cst_2 : f32 to vector<2x1024xf32>
    %6 = arith.subf %0, %5 : vector<2x1024xf32>
    %cst_3 = arith.constant 1.000000e+00 : f32
    %7 = vector.broadcast %cst_3 : f32 to vector<2x1024xf32>
    %8 = arith.mulf %6, %7 : vector<2x1024xf32>
    %cst_4 = arith.constant 0.000000e+00 : f32
    %9 = vector.broadcast %cst_4 : f32 to vector<2x1024xf32>
    %10 = arith.addf %8, %9 : vector<2x1024xf32>
    %cst_5 = arith.constant -1.500000e+00 : f32
    %11 = vector.broadcast %cst_5 : f32 to vector<2x1024xf32>
    %12 = arith.subf %0, %11 : vector<2x1024xf32>
    %cst_6 = arith.constant 0.180706635 : f32
    %13 = vector.broadcast %cst_6 : f32 to vector<2x1024xf32>
    %14 = arith.mulf %12, %13 : vector<2x1024xf32>
    %cst_7 = arith.constant -1.500000e+00 : f32
    %15 = vector.broadcast %cst_7 : f32 to vector<2x1024xf32>
    %16 = arith.addf %14, %15 : vector<2x1024xf32>
    %17 = math.tanh %0 : vector<2x1024xf32>
    %18 = arith.select %4, %16, %17 : vector<2x1024xi1>, vector<2x1024xf32>
    %19 = arith.select %2, %10, %18 : vector<2x1024xi1>, vector<2x1024xf32>
    %c0_8 = arith.constant 0 : index
    %c0_9 = arith.constant 0 : index
    %20 = vector.load %arg2[%c0_8, %c0_9] : memref<2x1024xf32, #tpu.memory_space<vmem>>, vector<2x1024xf32>
    tpu.vector_store %arg2[%c0_8, %c0_9], %19 {strides = array<i32>} : memref<2x1024xf32, #tpu.memory_space<vmem>>, vector<2x1024xf32>,
    return
  }
  func.func @transform_0(%arg0: i32) -> (i32, i32) {
    %c0_i32 = arith.constant 0 : i32
    %c0_i32_0 = arith.constant 0 : i32
    return %arg0, %c0_i32 : i32, i32
  }
  func.func @transform_1(%arg0: i32) -> (i32, i32) {
    %c0_i32 = arith.constant 0 : i32
    %c0_i32_0 = arith.constant 0 : i32
    return %arg0, %c0_i32 : i32, i32
  }
}

</mosaic_0001>

<bundles_post_ra>
// kernel: tpu_custom_call.1
= control target key start
LH: loop header
LB: loop body
LE: loop exit
PB: predicated region body
PF: predicated region fallthrough
CT: control target
= control target key end

     0   :  { %6 = vsyncpa [#allocation3], 0  ;;  %s150_s0 = inlined_call_operand.hbm [shape: f32[2,1024], index: 0, kind: input, shape index: {}]   ;;  %s151_s1 = inlined_call_operand.hbm [shape: f32[2,1024], index: 1, kind: output, shape index: {}]  }
   0x1   :  { %7 = vsyncpa [#allocation4], 0  ;;  %s114_s6 = smov [#allocation2]   ;;  %s66_s10 = scalar_lea.hbm %s150_s0, 256 }
   0x2   :  { %s14_s7 = sshll.u32 %s114_s6, 4  ;;  %p67_p0 = scmp.ne.s32.totalorder %s150_s0, %s66_s10  ;;  %s15_s7 = int_to_ptr.vmem [resolvable:$true] %s14_s7 }
   0x3   :  { %p70_p1 = scmp.lt.u32.totalorder %s66_s10, %s150_s0 }
   0x5   :  { %p72_p2 = pnand %p70_p1, %p67_p0 }
   0x7   :  { %75 = shalt.err (!%p72_p2)
}
   0x8   :  { %s76_s15 = scalar_lea.vmem %s15_s7, 256  ;;  %p81_p4 = scmp.lt.s32.totalorder %s15_s7, %s15_s7 }
   0x9   :  { %p77_p3 = scmp.ne.s32.totalorder %s15_s7, %s76_s15  ;;  %p82_p5 = scmp.lt.s32.totalorder %s76_s15, %s76_s15 }
   0xb   :  { %p83_p6 = por %p82_p5, %p81_p4 }
   0xd   :  { %p84_p7 = pnand %p83_p6, %p77_p3 }
   0xf   :  { %87 = shalt.err (!%p84_p7)
}
  0x10   :  { %17 = dma.hbm_to_vmem [thread:$0]  %s150_s0, 256, %s15_s7, [#allocation3]  }
  0x11   :  { %110 = dma.done.wait [#allocation3], 256  }
  0x12   :  { %111 = vsyncadd [#allocation3], 4294967040  ;;  %v21_v0 = vld [vmem:[#allocation2] sm:$0xff]  ;;  %v22_v1 = vld [vmem:[#allocation2 + $0x8] sm:$0xff]  ;;  %s115_s18 = smov [#allocation5]  }
  0x13   :  { %v58_v2 = vadd.f32 1.5, %v21_v0  ;;  %62 = vtanh.f32 %v21_v0  ;;  %v59_v3 = vadd.f32 1.5, %v22_v1  ;;  %vm25_vm0 = vcmp.le.f32.partialorder %v21_v0, -1.5  ;;  %s49_s19 = sshll.u32 %s115_s18, 4  ;;  %s50_s19 = int_to_ptr.vmem [resolvable:$true] %s49_s19 }
  0x14   :  { %64 = vtanh.f32 %v22_v1  ;;  %vm23_vm1 = vcmp.ge.f32.partialorder %v21_v0, 0.0  ;;  %vm26_vm2 = vcmp.le.f32.partialorder %v22_v1, -1.5  ;;  %vm24_vm3 = vcmp.ge.f32.partialorder %v22_v1, 0.0  ;;  %s88_s0 = scalar_lea.vmem %s50_s19, 256  ;;  %p93_p9 = scmp.lt.s32.totalorder %s50_s19, %s50_s19 }
  0x15   :  { %v31_v4 = vmul.f32 0.18070664, %v58_v2  ;;  %v32_v5 = vmul.f32 0.18070664, %v59_v3  ;;  %p89_p8 = scmp.ne.s32.totalorder %s50_s19, %s88_s0  ;;  %p94_p10 = scmp.lt.s32.totalorder %s88_s0, %s88_s0 }
  0x17   :  { %v33_v6 = vadd.f32 -1.5, %v31_v4  ;;  %v34_v7 = vadd.f32 -1.5, %v32_v5  ;;  %p95_p11 = por %p94_p10, %p93_p9 }
  0x19   :  { %p96_p12 = pnand %p95_p11, %p89_p8 }
  0x1d   :  { %v63_v8 = vpop.eup %62 }
  0x1e   :  { %v65_v9 = vpop.eup %64  ;;  %v37_v10 = vsel %vm25_vm0, %v33_v6, %v63_v8 }
  0x1f   :  { %v39_v11 = vsel %vm23_vm1, %v21_v0, %v37_v10  ;;  %v38_v12 = vsel %vm26_vm2, %v34_v7, %v65_v9 }
  0x20   :  { %41 = vst [vmem:[#allocation5] sm:$0xff] %v39_v11  ;;  %v40_v13 = vsel %vm24_vm3, %v22_v1, %v38_v12 }
  0x21   :  { %42 = vst [vmem:[#allocation5 + $0x8] sm:$0xff] %v40_v13 }
  0x22   :  { %99 = shalt.err (!%p96_p12)
}
  0x23   :  { %s100_s22 = scalar_lea.hbm %s151_s1, 256 }
  0x24   :  { %p101_p13 = scmp.ne.s32.totalorder %s151_s1, %s100_s22  ;;  %p104_p0 = scmp.lt.u32.totalorder %s100_s22, %s151_s1 }
  0x26   :  { %p106_p1 = pnand %p104_p0, %p101_p13 }
  0x28   :  { %109 = shalt.err (!%p106_p1)
}
  0x29   :  { %52 = dma.vmem_to_hbm [thread:$0]  %s50_s19, 256, %s151_s1, [#allocation4]  }
  0x2a   :  { %112 = dma.done.wait [#allocation4], 256  }
  0x2b   :  { %113 = vsyncadd [#allocation4], 4294967040 }
  0x2c   :  { %56 = vsyncpa [#allocation3], 1 }
  0x2d   :  { %57 = vsyncpa [#allocation4], 1 }

</bundles_post_ra>
